<compile_context>
chip_gen: v6e
topology: v6e:2x2x1
jax: 0.10.0
libtpu: 0.0.40
codegen_flags: <defaults>
</compile_context>

<pallas_src>
from functools import partial

import numpy as np
import jax
import jax.numpy as jnp
from jax import lax
from jax.experimental import pallas as pl
from jax.experimental.pallas import tpu as pltpu


def _round_up(n, m):
    return (n + m - 1) // m * m


def _sublane(dtype):
    # sublane tile for the compute dtype (8 for f32, 16 for bf16)
    return 8 * (4 // np.dtype(dtype).itemsize)


# ----------------------------- Pallas kernel (hot path) ----------------------------------

def _kabn_kernel(x_ref, m_ref, w_ref, o_ref, f_ref, *, spline_order, cin_stride, cp,
                 tap_shifts, eps, hw_true, compute_dtype):
    """One (batch, group) instance.

    x_ref: (1, cin_stride, HWp)  raw input x for this (b, g); zero-padded rows / lanes; f32
    m_ref: (taps, HWp)           per-tap output validity mask (1 inside image, 0 at halo / pad)
    w_ref: (1, taps*cp, Kt)      fused weights, Kt = (S+2)*cin_stride, compute dtype
    o_ref: (1, cp, HWp)          InstanceNorm+SiLU output, channels on sublanes, HW lane-dense
    f_ref: (Kt, HWp)             VMEM scratch: stacked [raw_x, B_0..B_S] feature matrix
    """
    S = spline_order
    x = x_ref[0]                                         # (cin_stride, HWp) f32
    hwp = x.shape[-1]

    # ---- stacked feature matrix F: computed ONCE on the raw tile (not per kernel tap) ------
    f_ref[0:cin_stride, :] = x.astype(compute_dtype)     # term 0: raw x (base conv)

    s32 = jax.nn.sigmoid(x)                              # f32 sigmoid of the raw input (EUP)
    s = s32.astype(compute_dtype)
    one_m_s = (1.0 - s32).astype(compute_dtype)

    # faithful port of the module's in-place de Casteljau recursion (VPU, compute dtype)
    b = [jnp.ones_like(s) for _ in range(S + 1)]
    for j in range(1, S + 1):
        nb = list(b)
        for k in range(S + 1 - j):
            nb[k] = b[k] * one_m_s + b[k + 1] * s
        b = nb
    for k in range(S + 1):
        f_ref[(k + 1) * cin_stride:(k + 2) * cin_stride, :] = b[k]

    # ---- one fused MXU dot over all taps (M) and all S+2 terms (K); f32 accumulation -------
    t_all = jnp.dot(w_ref[0], f_ref[...], preferred_element_type=jnp.float32)  # (taps*cp, HWp)

    # ---- implicit GEMM: shift each tap's result to its output offset and accumulate --------
    acc = jnp.zeros((cp, hwp), jnp.float32)
    for t, off in enumerate(tap_shifts):
        tt = t_all[t * cp:(t + 1) * cp, :]
        shift = (-off) % hwp
        if shift:
            tt = pltpu.roll(tt, shift=shift, axis=1)     # lane rotation (XLU, off the VALU slot)
        acc = acc + tt * m_ref[t:t + 1, :]               # zero out-of-image / lane-pad columns

    # ---- InstanceNorm2d(affine=False): one-pass stats over the hw_true real positions ------
    # (padded lane columns of acc are exactly zero, so they do not perturb the sums)
    inv_n = 1.0 / float(hw_true)
    ssum = jnp.sum(acc, axis=1, keepdims=True)
    ssq = jnp.sum(acc * acc, axis=1, keepdims=True)
    mean = ssum * inv_n
    var = jnp.maximum(ssq * inv_n - mean * mean, 0.0)
    yn = (acc - mean) * lax.rsqrt(var + eps)

    # ---- SiLU epilogue, lane-dense store -----------------------------------------------------
    o_ref[0] = (yn * jax.nn.sigmoid(yn)).astype(o_ref.dtype)


# ----------------------------- host-side preparation (runs once) --------------------------

def prepare_kabn_weights(base_w, poly_w, *, spline_order, compute_dtype=jnp.bfloat16):
    """Fuse base + Bernstein conv weights into (G, kh*kw*Cp, (S+2)*cin_stride), compute dtype.

    Row block t = kernel tap (i, j); column block k = feature term (0 = raw x, 1..S+1 = B_{k-1}).
    Note: nn.ModuleList([base_conv] * groups) repeats the SAME module, so base-conv weights are
    genuinely shared across groups.
    """
    G, cout_g, cin_sp, kh, kw = poly_w.shape
    S = spline_order
    cin_g = cin_sp // (S + 1)
    sub = _sublane(compute_dtype)
    cin_stride = _round_up(cin_g, sub)
    cp = _round_up(cout_g, 8)
    kt = (S + 2) * cin_stride
    taps = kh * kw

    w = jnp.zeros((G, taps, cp, kt), jnp.float32)
    base = jnp.transpose(base_w, (2, 3, 0, 1)).reshape(taps, cout_g, cin_g)
    w = w.at[:, :, :cout_g, 0:cin_g].set(base[None])                 # term 0: base conv
    # bernstein_poly channel layout is (ci, k) -> ci*(S+1)+k
    poly_r = poly_w.reshape(G, cout_g, cin_g, S + 1, kh, kw)
    for k in range(S + 1):
        pk = jnp.transpose(poly_r[:, :, :, k], (0, 3, 4, 1, 2)).reshape(G, taps, cout_g, cin_g)
        col = (k + 1) * cin_stride
        w = w.at[:, :, :cout_g, col:col + cin_g].set(pk)
    return w.reshape(G, taps * cp, kt).astype(compute_dtype)


def _tap_geometry(H, W, kh, kw, padding, dilation, hwp):
    """Per-tap constant lane shift + (taps, HWp) validity mask for the stride-1 "same" geometry:
    out[:, n] += T_tap[:, n + shift] where the shifted position stays inside the image."""
    taps = kh * kw
    shifts = []
    mask = np.zeros((taps, hwp), np.float32)
    hh, ww = np.meshgrid(np.arange(H), np.arange(W), indexing="ij")
    for i in range(kh):
        for j in range(kw):
            dh = i * dilation - padding
            dw = j * dilation - padding
            shifts.append(dh * W + dw)
            valid = (hh + dh >= 0) & (hh + dh < H) & (ww + dw >= 0) & (ww + dw < W)
            mask[i * kw + j, :H * W] = valid.astype(np.float32).reshape(-1)
    return tuple(shifts), jnp.asarray(mask)


# ----------------------------- forward -----------------------------------------------------

@partial(jax.jit, static_argnames=("spline_order", "kernel_size", "out_channels", "stride",
                                   "padding", "dilation", "groups", "eps", "compute_dtype"))
def kabn_conv2d_forward(x, w_slab, *, spline_order, kernel_size, out_channels,
                        stride=1, padding=1, dilation=1, groups=1, eps=1e-5,
                        compute_dtype=jnp.bfloat16):
    """Forward pass of KABNConvNDLayer (ndim=2, InstanceNorm2d(affine=False), SiLU, dropout=0)."""
    B, Cin, H, W = x.shape
    kh = kw = kernel_size
    if stride != 1 or 2 * padding != (kernel_size - 1) * dilation:
        # TODO(synk): general stride / padding needs the strided-gather (im2col) formulation.
        raise NotImplementedError("only stride=1 with 2*padding == (k-1)*dilation is supported")

    S = spline_order
    cin_g = Cin // groups
    cout_g = out_channels // groups
    sub = _sublane(compute_dtype)
    cin_stride = _round_up(cin_g, sub)
    cp = _round_up(cout_g, 8)
    kt = (S + 2) * cin_stride
    taps = kh * kw
    assert w_slab.shape == (groups, taps * cp, kt), "w_slab prepared with different settings"

    HW = H * W
    hwp = _round_up(HW, 128)
    shifts, tap_mask = _tap_geometry(H, W, kh, kw, padding, dilation, hwp)

    # raw x only (no im2col in HBM): (B*G, cin_stride, HWp), zero-padded rows / lanes, f32
    xg = x.reshape(B * groups, cin_g, HW)
    xg = jnp.pad(xg, ((0, 0), (0, cin_stride - cin_g), (0, hwp - HW))).astype(jnp.float32)

    kernel = partial(_kabn_kernel, spline_order=S, cin_stride=cin_stride, cp=cp,
                     tap_shifts=shifts, eps=eps, hw_true=HW, compute_dtype=compute_dtype)
    bg = B * groups
    out = pl.pallas_call(
        kernel,
        out_shape=jax.ShapeDtypeStruct((bg, cp, hwp), x.dtype),
        grid=(bg,),                                            # (B, G) collapsed: even extent
        in_specs=[
            pl.BlockSpec((1, cin_stride, hwp), lambda i: (i, 0, 0)),
            pl.BlockSpec((taps, hwp), lambda i: (0, 0)),       # tiny VMEM-resident tap masks
            pl.BlockSpec((1, taps * cp, kt), lambda i: (i % groups, 0, 0)),
        ],
        out_specs=pl.BlockSpec((1, cp, hwp), lambda i: (i, 0, 0)),
        scratch_shapes=[pltpu.VMEM((kt, hwp), compute_dtype)],
        compiler_params=pltpu.CompilerParams(
            dimension_semantics=("parallel",),
            vmem_limit_bytes=64 * 1024 * 1024),
    )(xg, tap_mask, w_slab)

    out = out.reshape(B, groups, cp, hwp)
    if cp != cout_g or hwp != HW:
        out = out[:, :, :cout_g, :HW]          # only pays a copy when padding was actually added
    return out.reshape(B, groups * cout_g, H, W)


# ----------------------------- reference (plain JAX, f32) ----------------------------------

def _bernstein_poly(x, order):
    """Faithful port of KABNConvNDLayer.bernstein_poly (in-place de Casteljau recursion)."""
    B, C, H, W = x.shape
    b = [jnp.ones_like(x) for _ in range(order + 1)]
    for j in range(1, order + 1):
        nb = list(b)
        for k in range(order + 1 - j):
            nb[k] = b[k] * (1.0 - x) + b[k + 1] * x
        b = nb
    bern = jnp.stack(b, axis=2)                        # == moveaxis(-1, 2)
    return bern.reshape(B, C * (order + 1), H, W)      # == flatten(1, 2)


def _reference(x, base_w, poly_w, *, spline_order, stride, padding, dilation, groups, eps=1e-5):
    B, Cin, H, W = x.shape
    cin_g = Cin // groups
    prec = lax.Precision.HIGHEST
    outs = []
    for g in range(groups):
        xg = x[:, g * cin_g:(g + 1) * cin_g]
        base_out = lax.conv_general_dilated(
            xg, base_w, (stride, stride), [(padding, padding)] * 2,
            rhs_dilation=(dilation, dilation),
            dimension_numbers=('NCHW', 'OIHW', 'NCHW'), precision=prec)
        bern = _bernstein_poly(jax.nn.sigmoid(xg), spline_order)
        poly_out = lax.conv_general_dilated(
            bern, poly_w[g], (stride, stride), [(padding, padding)] * 2,
            rhs_dilation=(dilation, dilation),
            dimension_numbers=('NCHW', 'OIHW', 'NCHW'), precision=prec)
        y = base_out + poly_out
        mean = y.mean(axis=(2, 3), keepdims=True)
        var = ((y - mean) ** 2).mean(axis=(2, 3), keepdims=True)
        yn = (y - mean) * lax.rsqrt(var + eps)
        outs.append(yn * jax.nn.sigmoid(yn))
    return jnp.concatenate(outs, axis=1)


# ----------------------------- main --------------------------------------------------------

if __name__ == "__main__":
    def run_case(B, Cin, Cout, H, W, spline_order, k, stride, padding, dilation, groups,
                 compute_dtype, rtol, atol):
        cin_g, cout_g = Cin // groups, Cout // groups
        key = jax.random.PRNGKey(0)
        kx, kb, kp = jax.random.split(key, 3)

        x = jax.random.normal(kx, (B, Cin, H, W), dtype=jnp.float32)

        # kaiming_uniform_(nonlinearity='linear'): bound = sqrt(3) / sqrt(fan_in)
        bound_base = float(np.sqrt(3.0) / np.sqrt(cin_g * k * k))
        base_w = jax.random.uniform(kb, (cout_g, cin_g, k, k), jnp.float32,
                                    minval=-bound_base, maxval=bound_base)
        bound_poly = float(np.sqrt(3.0) / np.sqrt(cin_g * (spline_order + 1) * k * k))
        poly_w = jax.random.uniform(kp, (groups, cout_g, cin_g * (spline_order + 1), k, k),
                                    jnp.float32, minval=-bound_poly, maxval=bound_poly)

        w_slab = prepare_kabn_weights(base_w, poly_w, spline_order=spline_order,
                                      compute_dtype=compute_dtype)
        y = kabn_conv2d_forward(x, w_slab, spline_order=spline_order, kernel_size=k,
                                out_channels=Cout, stride=stride, padding=padding,
                                dilation=dilation, groups=groups, compute_dtype=compute_dtype)
        y = jax.block_until_ready(y)

        y_ref = _reference(x, base_w, poly_w, spline_order=spline_order, stride=stride,
                           padding=padding, dilation=dilation, groups=groups)
        np.testing.assert_allclose(np.asarray(y), np.asarray(y_ref), rtol=rtol, atol=atol)
        assert y.shape == (B, Cout, H, W)

    # primary perf configuration: bf16 basis/MXU inputs, f32 sigmoid / accumulation / norm / SiLU
    run_case(2, 4, 8, 16, 16, 3, 3, 1, 1, 1, 1, jnp.bfloat16, 5e-2, 5e-2)
    # f32 check of the fused implicit-GEMM structure
    run_case(2, 4, 8, 16, 16, 3, 3, 1, 1, 1, 1, jnp.float32, 1e-3, 1e-3)
    # grouped case exercising the collapsed (B*G) grid and the cropped-output path
    run_case(2, 4, 8, 16, 16, 3, 3, 1, 1, 1, 2, jnp.float32, 1e-3, 1e-3)

    print("KERNEL_OK")
</pallas_src>

<mosaic_0001>
module attributes {stable_mosaic.version = 11 : i64} {
  func.func @_kabn_kernel(%arg0: i32, %arg1: memref<1x16x256xf32, #tpu.memory_space<vmem>>, %arg2: memref<9x256xf32, #tpu.memory_space<vmem>>, %arg3: memref<1x72x80xbf16, #tpu.memory_space<vmem>>, %arg4: memref<1x8x256xf32, #tpu.memory_space<vmem>>, %arg5: memref<80x256xbf16, #tpu.memory_space<vmem>>) attributes {dimension_semantics = [#tpu.dimension_semantics<parallel>], iteration_bounds = array<i64: 2>, scalar_prefetch = 0 : i64, scratch_operands = 1 : i64, tpu.core_type = #tpu.core_type<tc>, window_params = [{transform_indices = @transform_0, window_bounds = array<i64: 1, 16, 256>}, {pipeline_mode = #tpu.pipeline_mode<synchronous>, transform_indices = @transform_1, window_bounds = array<i64: 9, 256>}, {transform_indices = @transform_2, window_bounds = array<i64: 1, 72, 80>}, {transform_indices = @transform_3, window_bounds = array<i64: 1, 8, 256>}]} {
    %c0 = arith.constant 0 : index
    %c0_0 = arith.constant 0 : index
    %c0_1 = arith.constant 0 : index
    %0 = vector.load %arg1[%c0, %c0_0, %c0_1] : memref<1x16x256xf32, #tpu.memory_space<vmem>>, vector<1x16x256xf32>
    %1 = vector.shape_cast %0 : vector<1x16x256xf32> to vector<16x256xf32>
    %2 = arith.truncf %1 : vector<16x256xf32> to vector<16x256xbf16>
    %c0_2 = arith.constant 0 : index
    %c0_3 = arith.constant 0 : index
    %3 = vector.load %arg5[%c0_2, %c0_3] : memref<80x256xbf16, #tpu.memory_space<vmem>>, vector<16x256xbf16>
    tpu.vector_store %arg5[%c0_2, %c0_3], %2 {strides = array<i32>} : memref<80x256xbf16, #tpu.memory_space<vmem>>, vector<16x256xbf16>,
    %4 = arith.negf %1 : vector<16x256xf32>
    %5 = math.exp %4 : vector<16x256xf32>
    %cst = arith.constant 1.000000e+00 : f32
    %6 = vector.broadcast %cst : f32 to vector<16x256xf32>
    %7 = arith.addf %6, %5 : vector<16x256xf32>
    %8 = arith.divf %6, %7 : vector<16x256xf32>
    %9 = arith.truncf %8 : vector<16x256xf32> to vector<16x256xbf16>
    %cst_4 = arith.constant 1.000000e+00 : f32
    %10 = vector.broadcast %cst_4 : f32 to vector<16x256xf32>
    %11 = arith.subf %10, %8 : vector<16x256xf32>
    %12 = arith.truncf %11 : vector<16x256xf32> to vector<16x256xbf16>
    %cst_5 = arith.constant 1.000000e+00 : bf16
    %13 = vector.broadcast %cst_5 : bf16 to vector<16x256xbf16>
    %cst_6 = arith.constant 1.000000e+00 : bf16
    %14 = vector.broadcast %cst_6 : bf16 to vector<16x256xbf16>
    %cst_7 = arith.constant 1.000000e+00 : bf16
    %15 = vector.broadcast %cst_7 : bf16 to vector<16x256xbf16>
    %cst_8 = arith.constant 1.000000e+00 : bf16
    %16 = vector.broadcast %cst_8 : bf16 to vector<16x256xbf16>
    %17 = arith.mulf %13, %12 : vector<16x256xbf16>
    %18 = arith.mulf %14, %9 : vector<16x256xbf16>
    %19 = arith.addf %17, %18 : vector<16x256xbf16>
    %20 = arith.mulf %14, %12 : vector<16x256xbf16>
    %21 = arith.mulf %15, %9 : vector<16x256xbf16>
    %22 = arith.addf %20, %21 : vector<16x256xbf16>
    %23 = arith.mulf %15, %12 : vector<16x256xbf16>
    %24 = arith.mulf %16, %9 : vector<16x256xbf16>
    %25 = arith.addf %23, %24 : vector<16x256xbf16>
    %26 = arith.mulf %19, %12 : vector<16x256xbf16>
    %27 = arith.mulf %22, %9 : vector<16x256xbf16>
    %28 = arith.addf %26, %27 : vector<16x256xbf16>
    %29 = arith.mulf %22, %12 : vector<16x256xbf16>
    %30 = arith.mulf %25, %9 : vector<16x256xbf16>
    %31 = arith.addf %29, %30 : vector<16x256xbf16>
    %32 = arith.mulf %28, %12 : vector<16x256xbf16>
    %33 = arith.mulf %31, %9 : vector<16x256xbf16>
    %34 = arith.addf %32, %33 : vector<16x256xbf16>
    %c16 = arith.constant 16 : index
    %c0_9 = arith.constant 0 : index
    %35 = vector.load %arg5[%c16, %c0_9] : memref<80x256xbf16, #tpu.memory_space<vmem>>, vector<16x256xbf16>
    tpu.vector_store %arg5[%c16, %c0_9], %34 {strides = array<i32>} : memref<80x256xbf16, #tpu.memory_space<vmem>>, vector<16x256xbf16>,
    %c32 = arith.constant 32 : index
    %c0_10 = arith.constant 0 : index
    %36 = vector.load %arg5[%c32, %c0_10] : memref<80x256xbf16, #tpu.memory_space<vmem>>, vector<16x256xbf16>
    tpu.vector_store %arg5[%c32, %c0_10], %31 {strides = array<i32>} : memref<80x256xbf16, #tpu.memory_space<vmem>>, vector<16x256xbf16>,
    %c48 = arith.constant 48 : index
    %c0_11 = arith.constant 0 : index
    %37 = vector.load %arg5[%c48, %c0_11] : memref<80x256xbf16, #tpu.memory_space<vmem>>, vector<16x256xbf16>
    tpu.vector_store %arg5[%c48, %c0_11], %25 {strides = array<i32>} : memref<80x256xbf16, #tpu.memory_space<vmem>>, vector<16x256xbf16>,
    %c64 = arith.constant 64 : index
    %c0_12 = arith.constant 0 : index
    %38 = vector.load %arg5[%c64, %c0_12] : memref<80x256xbf16, #tpu.memory_space<vmem>>, vector<16x256xbf16>
    tpu.vector_store %arg5[%c64, %c0_12], %16 {strides = array<i32>} : memref<80x256xbf16, #tpu.memory_space<vmem>>, vector<16x256xbf16>,
    %c0_13 = arith.constant 0 : index
    %c0_14 = arith.constant 0 : index
    %c0_15 = arith.constant 0 : index
    %39 = vector.load %arg3[%c0_13, %c0_14, %c0_15] : memref<1x72x80xbf16, #tpu.memory_space<vmem>>, vector<1x72x80xbf16>
    %40 = vector.shape_cast %39 : vector<1x72x80xbf16> to vector<72x80xbf16>
    %c0_16 = arith.constant 0 : index
    %c0_17 = arith.constant 0 : index
    %41 = vector.load %arg5[%c0_16, %c0_17] : memref<80x256xbf16, #tpu.memory_space<vmem>>, vector<80x256xbf16>
    %cst_18 = arith.constant dense<0.000000e+00> : vector<72x256xf32>
    %42 = tpu.matmul %40, %41, %cst_18 {dimension_numbers = #tpu.dot_dimension_numbers<[1], [0], [0], [1], [0, 0, 1, 1], [], []>} : vector<72x80xbf16>, vector<80x256xbf16>, vector<72x256xf32> -> vector<72x256xf32>
    %cst_19 = arith.constant 0.000000e+00 : f32
    %43 = vector.broadcast %cst_19 : f32 to vector<8x256xf32>
    %44 = vector.extract_strided_slice %42 {offsets = [0, 0], sizes = [8, 256], strides = [1, 1]} : vector<72x256xf32> to vector<8x256xf32>
    %c17_i32 = arith.constant 17 : i32
    %45 = tpu.dynamic_rotate %44 by %c17_i32 dim 1 : vector<8x256xf32>, i32 -> vector<8x256xf32>
    %c0_20 = arith.constant 0 : index
    %c0_21 = arith.constant 0 : index
    %46 = vector.load %arg2[%c0_20, %c0_21] : memref<9x256xf32, #tpu.memory_space<vmem>>, vector<1x256xf32>
    %47 = vector.broadcast %46 : vector<1x256xf32> to vector<8x256xf32>
    %48 = arith.mulf %45, %47 : vector<8x256xf32>
    %49 = arith.addf %43, %48 : vector<8x256xf32>
    %50 = vector.extract_strided_slice %42 {offsets = [8, 0], sizes = [8, 256], strides = [1, 1]} : vector<72x256xf32> to vector<8x256xf32>
    %c16_i32 = arith.constant 16 : i32
    %51 = tpu.dynamic_rotate %50 by %c16_i32 dim 1 : vector<8x256xf32>, i32 -> vector<8x256xf32>
    %c1 = arith.constant 1 : index
    %c0_22 = arith.constant 0 : index
    %52 = vector.load %arg2[%c1, %c0_22] : memref<9x256xf32, #tpu.memory_space<vmem>>, vector<1x256xf32>
    %53 = vector.broadcast %52 : vector<1x256xf32> to vector<8x256xf32>
    %54 = arith.mulf %51, %53 : vector<8x256xf32>
    %55 = arith.addf %49, %54 : vector<8x256xf32>
    %56 = vector.extract_strided_slice %42 {offsets = [16, 0], sizes = [8, 256], strides = [1, 1]} : vector<72x256xf32> to vector<8x256xf32>
    %c15_i32 = arith.constant 15 : i32
    %57 = tpu.dynamic_rotate %56 by %c15_i32 dim 1 : vector<8x256xf32>, i32 -> vector<8x256xf32>
    %c2 = arith.constant 2 : index
    %c0_23 = arith.constant 0 : index
    %58 = vector.load %arg2[%c2, %c0_23] : memref<9x256xf32, #tpu.memory_space<vmem>>, vector<1x256xf32>
    %59 = vector.broadcast %58 : vector<1x256xf32> to vector<8x256xf32>
    %60 = arith.mulf %57, %59 : vector<8x256xf32>
    %61 = arith.addf %55, %60 : vector<8x256xf32>
    %62 = vector.extract_strided_slice %42 {offsets = [24, 0], sizes = [8, 256], strides = [1, 1]} : vector<72x256xf32> to vector<8x256xf32>
    %c1_i32 = arith.constant 1 : i32
    %63 = tpu.dynamic_rotate %62 by %c1_i32 dim 1 : vector<8x256xf32>, i32 -> vector<8x256xf32>
    %c3 = arith.constant 3 : index
    %c0_24 = arith.constant 0 : index
    %64 = vector.load %arg2[%c3, %c0_24] : memref<9x256xf32, #tpu.memory_space<vmem>>, vector<1x256xf32>
    %65 = vector.broadcast %64 : vector<1x256xf32> to vector<8x256xf32>
    %66 = arith.mulf %63, %65 : vector<8x256xf32>
    %67 = arith.addf %61, %66 : vector<8x256xf32>
    %68 = vector.extract_strided_slice %42 {offsets = [32, 0], sizes = [8, 256], strides = [1, 1]} : vector<72x256xf32> to vector<8x256xf32>
    %c4 = arith.constant 4 : index
    %c0_25 = arith.constant 0 : index
    %69 = vector.load %arg2[%c4, %c0_25] : memref<9x256xf32, #tpu.memory_space<vmem>>, vector<1x256xf32>
    %70 = vector.broadcast %69 : vector<1x256xf32> to vector<8x256xf32>
    %71 = arith.mulf %68, %70 : vector<8x256xf32>
    %72 = arith.addf %67, %71 : vector<8x256xf32>
    %73 = vector.extract_strided_slice %42 {offsets = [40, 0], sizes = [8, 256], strides = [1, 1]} : vector<72x256xf32> to vector<8x256xf32>
    %c255_i32 = arith.constant 255 : i32
    %74 = tpu.dynamic_rotate %73 by %c255_i32 dim 1 : vector<8x256xf32>, i32 -> vector<8x256xf32>
    %c5 = arith.constant 5 : index
    %c0_26 = arith.constant 0 : index
    %75 = vector.load %arg2[%c5, %c0_26] : memref<9x256xf32, #tpu.memory_space<vmem>>, vector<1x256xf32>
    %76 = vector.broadcast %75 : vector<1x256xf32> to vector<8x256xf32>
    %77 = arith.mulf %74, %76 : vector<8x256xf32>
    %78 = arith.addf %72, %77 : vector<8x256xf32>
    %79 = vector.extract_strided_slice %42 {offsets = [48, 0], sizes = [8, 256], strides = [1, 1]} : vector<72x256xf32> to vector<8x256xf32>
    %c241_i32 = arith.constant 241 : i32
    %80 = tpu.dynamic_rotate %79 by %c241_i32 dim 1 : vector<8x256xf32>, i32 -> vector<8x256xf32>
    %c6 = arith.constant 6 : index
    %c0_27 = arith.constant 0 : index
    %81 = vector.load %arg2[%c6, %c0_27] : memref<9x256xf32, #tpu.memory_space<vmem>>, vector<1x256xf32>
    %82 = vector.broadcast %81 : vector<1x256xf32> to vector<8x256xf32>
    %83 = arith.mulf %80, %82 : vector<8x256xf32>
    %84 = arith.addf %78, %83 : vector<8x256xf32>
    %85 = vector.extract_strided_slice %42 {offsets = [56, 0], sizes = [8, 256], strides = [1, 1]} : vector<72x256xf32> to vector<8x256xf32>
    %c240_i32 = arith.constant 240 : i32
    %86 = tpu.dynamic_rotate %85 by %c240_i32 dim 1 : vector<8x256xf32>, i32 -> vector<8x256xf32>
    %c7 = arith.constant 7 : index
    %c0_28 = arith.constant 0 : index
    %87 = vector.load %arg2[%c7, %c0_28] : memref<9x256xf32, #tpu.memory_space<vmem>>, vector<1x256xf32>
    %88 = vector.broadcast %87 : vector<1x256xf32> to vector<8x256xf32>
    %89 = arith.mulf %86, %88 : vector<8x256xf32>
    %90 = arith.addf %84, %89 : vector<8x256xf32>
    %91 = vector.extract_strided_slice %42 {offsets = [64, 0], sizes = [8, 256], strides = [1, 1]} : vector<72x256xf32> to vector<8x256xf32>
    %c239_i32 = arith.constant 239 : i32
    %92 = tpu.dynamic_rotate %91 by %c239_i32 dim 1 : vector<8x256xf32>, i32 -> vector<8x256xf32>
    %c8 = arith.constant 8 : index
    %c0_29 = arith.constant 0 : index
    %93 = vector.load %arg2[%c8, %c0_29] : memref<9x256xf32, #tpu.memory_space<vmem>>, vector<1x256xf32>
    %94 = vector.broadcast %93 : vector<1x256xf32> to vector<8x256xf32>
    %95 = arith.mulf %92, %94 : vector<8x256xf32>
    %96 = arith.addf %90, %95 : vector<8x256xf32>
    %cst_30 = arith.constant dense<0.000000e+00> : vector<8xf32>
    %97 = vector.multi_reduction <add>, %96, %cst_30 [1] : vector<8x256xf32> to vector<8xf32>
    %98 = vector.shape_cast %97 : vector<8xf32> to vector<8x1xf32>
    %99 = arith.mulf %96, %96 : vector<8x256xf32>
    %cst_31 = arith.constant dense<0.000000e+00> : vector<8xf32>
    %100 = vector.multi_reduction <add>, %99, %cst_31 [1] : vector<8x256xf32> to vector<8xf32>
    %101 = vector.shape_cast %100 : vector<8xf32> to vector<8x1xf32>
    %cst_32 = arith.constant 3.906250e-03 : f32
    %102 = vector.broadcast %cst_32 : f32 to vector<8x1xf32>
    %103 = arith.mulf %98, %102 : vector<8x1xf32>
    %cst_33 = arith.constant 3.906250e-03 : f32
    %104 = vector.broadcast %cst_33 : f32 to vector<8x1xf32>
    %105 = arith.mulf %101, %104 : vector<8x1xf32>
    %106 = arith.mulf %103, %103 : vector<8x1xf32>
    %107 = arith.subf %105, %106 : vector<8x1xf32>
    %cst_34 = arith.constant 0.000000e+00 : f32
    %108 = vector.broadcast %cst_34 : f32 to vector<8x1xf32>
    %109 = arith.maximumf %107, %108 : vector<8x1xf32>
    %110 = vector.broadcast %103 : vector<8x1xf32> to vector<8x256xf32>
    %111 = arith.subf %96, %110 : vector<8x256xf32>
    %cst_35 = arith.constant 9.99999974E-6 : f32
    %112 = vector.broadcast %cst_35 : f32 to vector<8x1xf32>
    %113 = arith.addf %109, %112 : vector<8x1xf32>
    %114 = math.rsqrt %113 : vector<8x1xf32>
    %115 = vector.broadcast %114 : vector<8x1xf32> to vector<8x256xf32>
    %116 = arith.mulf %111, %115 : vector<8x256xf32>
    %117 = arith.negf %116 : vector<8x256xf32>
    %118 = math.exp %117 : vector<8x256xf32>
    %cst_36 = arith.constant 1.000000e+00 : f32
    %119 = vector.broadcast %cst_36 : f32 to vector<8x256xf32>
    %120 = arith.addf %119, %118 : vector<8x256xf32>
    %121 = arith.divf %119, %120 : vector<8x256xf32>
    %122 = arith.mulf %116, %121 : vector<8x256xf32>
    %c0_37 = arith.constant 0 : index
    %c0_38 = arith.constant 0 : index
    %c0_39 = arith.constant 0 : index
    %123 = vector.load %arg4[%c0_37, %c0_38, %c0_39] : memref<1x8x256xf32, #tpu.memory_space<vmem>>, vector<1x8x256xf32>
    %124 = vector.shape_cast %123 : vector<1x8x256xf32> to vector<8x256xf32>
    %125 = vector.shape_cast %122 : vector<8x256xf32> to vector<1x8x256xf32>
    tpu.vector_store %arg4[%c0_37, %c0_38, %c0_39], %125 {strides = array<i32>} : memref<1x8x256xf32, #tpu.memory_space<vmem>>, vector<1x8x256xf32>,
    return
  }
  func.func @transform_0(%arg0: i32) -> (i32, i32, i32) {
    %c0_i32 = arith.constant 0 : i32
    %c0_i32_0 = arith.constant 0 : i32
    %c0_i32_1 = arith.constant 0 : i32
    return %arg0, %c0_i32, %c0_i32_0 : i32, i32, i32
  }
  func.func @transform_1(%arg0: i32) -> (i32, i32) {
    %c0_i32 = arith.constant 0 : i32
    %c0_i32_0 = arith.constant 0 : i32
    %c0_i32_1 = arith.constant 0 : i32
    return %c0_i32, %c0_i32_0 : i32, i32
  }
  func.func @transform_2(%arg0: i32) -> (i32, i32, i32) {
    %c1_i32 = arith.constant 1 : i32
    %c0_i32 = arith.constant 0 : i32
    %0 = arith.cmpi eq, %c1_i32, %c0_i32 : i32
    %c1_i32_0 = arith.constant 1 : i32
    %1 = arith.select %0, %c1_i32_0, %c1_i32 : i32
    %2 = arith.remsi %arg0, %1 : i32
    %c0_i32_1 = arith.constant 0 : i32
    %3 = arith.cmpi ne, %2, %c0_i32_1 : i32
    %c0_i32_2 = arith.constant 0 : i32
    %4 = arith.cmpi slt, %2, %c0_i32_2 : i32
    %c0_i32_3 = arith.constant 0 : i32
    %5 = arith.cmpi slt, %1, %c0_i32_3 : i32
    %6 = arith.xori %4, %5 : i1
    %7 = arith.andi %6, %3 : i1
    %8 = arith.addi %2, %1 : i32
    %9 = arith.select %7, %8, %2 : i32
    %c0_i32_4 = arith.constant 0 : i32
    %c0_i32_5 = arith.constant 0 : i32
    %c0_i32_6 = arith.constant 0 : i32
    return %9, %c0_i32_4, %c0_i32_5 : i32, i32, i32
  }
  func.func @transform_3(%arg0: i32) -> (i32, i32, i32) {
    %c0_i32 = arith.constant 0 : i32
    %c0_i32_0 = arith.constant 0 : i32
    %c0_i32_1 = arith.constant 0 : i32
    return %arg0, %c0_i32, %c0_i32_0 : i32, i32, i32
  }
}

</mosaic_0001>

<bundles_post_ra>
// kernel: kabn_conv2d_forward.1
= control target key start
LH: loop header
LB: loop body
LE: loop exit
PB: predicated region body
PF: predicated region fallthrough
CT: control target
= control target key end

     0   :  { %s920_s12 = smov 0   ;;  %s1054_s0 = inlined_call_operand.vmem [shape: f32[2,16,256], index: 0, kind: input, shape index: {}]   ;;  %s1055_s1 = inlined_call_operand.vmem [shape: f32[9,256], index: 1, kind: input, shape index: {}]   ;;  %s1056_s2 = inlined_call_operand.vmem [shape: bf16[1,72,80], index: 2, kind: input, shape index: {}]   ;;  %s1057_s3 = inlined_call_operand.vmem [shape: f32[2,8,256], index: 3, kind: output, shape index: {}]  }
   0x1 LB: > { %s764_s13 = sadd.s32 4294967295, %s888_s12   ;;  %p768_p0 = scmp.ge.s32.totalorder %s888_s12, 1  ;;  %s888_s12 = sphi %s920_s12, %s13_s12  }
   0x2   : > { %p137_p1 = scmp.lt.s32.totalorder %s888_s12, 3 }
   0x4   : > { %p138_p2 = pnand %p768_p0, %p137_p1 }
   0x5   : > { %p161_p3 = scmp.lt.s32.totalorder (!%p138_p2), %s764_s13, 1  ;;  %s892_s28 = smov (!%p138_p2), 17  }
   0x6   : > { %141 = sbr.rel (%p138_p2) target bundleno = 616 (0x268), region = 32  ;;  %s893_s29 = smov (!%p138_p2), 113  }
   0x7   : > { %s894_s30 = smov (!%p138_p2), 16   ;;  %s895_s4 = smov (!%p138_p2), 15  }
   0x8   : > { %s896_s5 = smov (!%p138_p2), 1   ;;  %s897_s6 = smov (!%p138_p2), 127  }
   0x9   : > { %s898_s7 = smov (!%p138_p2), 112   ;;  %s899_s8 = smov (!%p138_p2), 111  }
   0xb   : > { %v890_v0 = vmov 1065369472   ;;  %v891_v3 = vmov 0   ;;  %s1059_s13 = smov (!%p161_p3, %s764_s13), 1  ;;  %v851_v48 = vld [vmem:[%s1056_s2] sm:$0xff]   ;;  %v852_v49 = vld [vmem:[%s1056_s2 + $0x18] sm:$0xff]  }
   0xc   : > { %v799_v1 = vcombine.high %v890_v0, %v890_v0  ;;  %v798_v2 = vcombine.low %v890_v0, %v890_v0  ;;  %415 = vmatprep.mubr.bf16.mxu0 %v891_v3  ;;  %445 = vmatprep.mubr.bf16.mxu1 %v891_v3  ;;  %s817_s14 = sshll.u32 %s1059_s13, 5  ;;  %vm367_vm0 = vcmask 654336   ;;  %v853_v50 = vld [vmem:[%s1056_s2 + $0x8] sm:$0xff]   ;;  %v855_v51 = vld [vmem:[%s1056_s2 + $0x20] ss:$0 sps:$4 sm:$0xff]   ;;  %v854_v52 = vld [vmem:[%s1056_s2 + $0x10] sm:$0xff]  }
   0xd   : > { %s165_s17 = scalar_lea.vmem %s1054_s0, %s817_s14 }
   0xe   : > { %389 = vmatprep.subr.bf16.mxu0 %v799_v1  ;;  %823 = vmatprep.subr.bf16.mxu1 %v799_v1  ;;  %v174_v4 = vld [vmem:[%s165_s17 + $0x8] sm:$0xff]  ;;  %v176_v5 = vld [vmem:[%s165_s17 + $0x18] sm:$0xff]  ;;  %v173_v6 = vld [vmem:[%s165_s17] sm:$0xff] }
   0xf   : > { %390 = vmatpush1.bf16.msra.mxu0 %v798_v2  ;;  %828 = vmatpush1.bf16.msra.mxu1 %v798_v2  ;;  %v776_v7 = vmul.f32 -1.442695, %v174_v4  ;;  %v778_v8 = vmul.f32 -1.442695, %v176_v5  ;;  %v175_v9 = vld [vmem:[%s165_s17 + $0x10] sm:$0xff]  ;;  %v822_v45 = vpack.c.bf16 %v176_v5, %v174_v4 }
  0x10   : > { %v775_v10 = vmul.f32 -1.442695, %v173_v6  ;;  %v777_v11 = vmul.f32 -1.442695, %v175_v9  ;;  %v821_v47 = vpack.c.bf16 %v175_v9, %v173_v6  ;;  %v468_v9 = vlaneseq }
  0x11   : > { %856 = vpow2.f32 %v776_v7 }
  0x12   : > { %858 = vpow2.f32 %v778_v8 }
  0x13   : > { %860 = vpow2.f32 %v775_v10 }
  0x14   : > { %862 = vpow2.f32 %v777_v11 }
  0x1e   : > { %v857_v12 = vpop.eup %856 }
  0x1f   : > { %v859_v13 = vpop.eup %858  ;;  %v204_v14 = vadd.f32 1.0, %v857_v12  ;;  %v476_v12 = vshrl.u32 %v468_v9, 7 }
  0x20   : > { %v861_v15 = vpop.eup %860  ;;  %v206_v16 = vadd.f32 1.0, %v859_v13 }
  0x21   : > { %v863_v17 = vpop.eup %862  ;;  %864 = vrcp.f32 %v204_v14  ;;  %v203_v18 = vadd.f32 1.0, %v861_v15  ;;  %v962_v14 = vand.u32 127, %v468_v9 }
  0x22   : > { %866 = vrcp.f32 %v206_v16  ;;  %v205_v19 = vadd.f32 1.0, %v863_v17  ;;  %v805_v16 = vld [vmem:[%s1055_s1 + $0x1] ss:$8 sm:$0x3]  ;;  %v967_v17 = vsub.s32 0, %v476_v12 }
  0x23   : > { %868 = vrcp.f32 %v203_v18  ;;  %v969_v18 = vsub.s32 1, %v476_v12  ;;  %vm493_vm1 = vcmp.lt.s32.totalorder %v962_v14, 16  ;;  %vm470_vm2 = vcmp.lt.s32.totalorder %v962_v14, 17 }
  0x24   : > { %870 = vrcp.f32 %v205_v19  ;;  %v473_v19 = vld [vmem:[%s1055_s1] ss:$8 sm:$0x3]  ;;  %vm517_vm3 = vcmp.lt.s32.totalorder %v962_v14, 15  ;;  %vm541_vm4 = vcmp.lt.s32.totalorder %v962_v14, 1  ;;  %vm606_vm5 = vcmp.lt.s32.totalorder %v962_v14, 113 }
  0x25   : > { %vm582_vm6 = vcmp.lt.s32.totalorder %v962_v14, 127  ;;  %vm630_vm7 = vcmp.lt.s32.totalorder %v962_v14, 112  ;;  %vm654_vm8 = vcmp.lt.s32.totalorder %v962_v14, 111 }
  0x2e   : > { %v865_v20 = vpop.eup %864 }
  0x2f   : > { %v867_v21 = vpop.eup %866  ;;  %v218_v22 = vsub.f32 1.0, %v865_v20 }
  0x30   : > { %v869_v23 = vpop.eup %868  ;;  %v216_v24 = vpack.c.bf16 %v867_v21, %v865_v20  ;;  %v220_v25 = vsub.f32 1.0, %v867_v21  ;;  %v806_v21 = vld [vmem:[%s1055_s1 + $0x2] ss:$8 sm:$0x3] }
  0x31   : > { %v871_v26 = vpop.eup %870  ;;  %v217_v27 = vsub.f32 1.0, %v869_v23 }
  0x32   : > { %v222_v28 = vpack.c.bf16 %v220_v25, %v218_v22  ;;  %v215_v29 = vpack.c.bf16 %v871_v26, %v869_v23  ;;  %v219_v30 = vsub.f32 1.0, %v871_v26  ;;  %v502_v22 = vrot.slane %v805_v16, %v967_v17 }
  0x33   : > { %v506_v23 = vrot.slane %v805_v16, %v969_v18  ;;  %v478_v25 = vrot.slane %v473_v19, %v967_v17 }
  0x34   : > { %v224_v31 = vadd.bf16 %v222_v28, %v216_v24  ;;  %v221_v32 = vpack.c.bf16 %v219_v30, %v217_v27  ;;  %v526_v30 = vrot.slane %v806_v21, %v967_v17 }
  0x36   : > { %391 = vmatprep.subr.bf16.mxu0 %v224_v31  ;;  %824 = vmatprep.subr.bf16.mxu1 %v224_v31  ;;  %v223_v33 = vadd.bf16 %v221_v32, %v215_v29  ;;  %v226_v34 = vmul.bf16 %v224_v31, %v222_v28  ;;  %v228_v35 = vmul.bf16 %v224_v31, %v216_v24 }
  0x37   : > { %v530_v31 = vrot.slane %v806_v21, %v969_v18 }
  0x38   : > { %392 = vmatpush1.bf16.msra.mxu0 %v223_v33  ;;  %829 = vmatpush1.bf16.msra.mxu1 %v223_v33  ;;  %v230_v36 = vadd.bf16 %v228_v35, %v226_v34  ;;  %v225_v37 = vmul.bf16 %v223_v33, %v221_v32  ;;  %v227_v38 = vmul.bf16 %v223_v33, %v215_v29  ;;  %v808_v33 = vld [vmem:[%s1055_s1 + $0x4] ss:$8 sm:$0x3] }
  0x3a   : > { %393 = vmatprep.subr.bf16.mxu0 %v230_v36  ;;  %825 = vmatprep.subr.bf16.mxu1 %v230_v36  ;;  %v229_v39 = vadd.bf16 %v227_v38, %v225_v37  ;;  %v232_v40 = vmul.bf16 %v230_v36, %v222_v28  ;;  %v234_v41 = vmul.bf16 %v230_v36, %v216_v24  ;;  %v810_v36 = vld [vmem:[%s1055_s1 + $0x6] ss:$8 sm:$0x3] }
  0x3b   : > { %v482_v28 = vrot.slane %v473_v19, %v969_v18 }
  0x3c   : > { %394 = vmatpush1.bf16.msra.mxu0 %v229_v39  ;;  %830 = vmatpush1.bf16.msra.mxu1 %v229_v39  ;;  %v236_v42 = vadd.bf16 %v234_v41, %v232_v40  ;;  %v231_v43 = vmul.bf16 %v229_v39, %v221_v32  ;;  %v233_v44 = vmul.bf16 %v229_v39, %v215_v29  ;;  %v807_v32 = vld [vmem:[%s1055_s1 + $0x3] ss:$8 sm:$0x3] }
  0x3e   : > { %395 = vmatprep.subr.bf16.mxu0 %v236_v42  ;;  %826 = vmatprep.subr.bf16.mxu1 %v236_v42  ;;  %v235_v46 = vadd.bf16 %v233_v44, %v231_v43  ;;  %v550_v42 = vrot.slane %v807_v32, %v967_v17  ;;  %v554_v43 = vrot.slane %v807_v32, %v969_v18 }
  0x40   : > { %396 = vmatpush1.bf16.msra.mxu0 %v235_v46  ;;  %831 = vmatpush1.bf16.msra.mxu1 %v235_v46 }
  0x41   : > { %397 = vmatprep.subr.bf16.mxu0 %v822_v45  ;;  %827 = vmatprep.subr.bf16.mxu1 %v822_v45 }
  0x44   : > { %398 = vmatpush1.bf16.msra.mxu0 %v821_v47  ;;  %832 = vmatpush1.bf16.msra.mxu1 %v821_v47 }
  0x47   : > { %800 = vmatmul.mubr.msk.bf16.vlgmr.msra.gmra.mxu0 %vm367_vm0, %v851_v48  ;;  %803 = vmatmul.mubr.msk.bf16.vlgmr.msra.gmra.mxu1 %vm367_vm0, %v852_v49  ;;  %v809_v49 = vld [vmem:[%s1055_s1 + $0x5] ss:$8 sm:$0x3] }
  0x48   : > { %425 = vmatprep.mubr.bf16.mxu0 %v891_v3  ;;  %455 = vmatprep.mubr.bf16.mxu1 %v891_v3 }
  0x4f   : > { %801 = vmatmul.mubr.msk.bf16.gmra.mxu0 %vm367_vm0, %v853_v50  ;;  %804 = vmatmul.mubr.msk.bf16.gmra.mxu1 %vm367_vm0, %v855_v51  ;;  %v567_v50 = vrot.slane %v808_v33, %v967_v17  ;;  %v571_v51 = vrot.slane %v808_v33, %v969_v18 }
  0x50   : > { %435 = vmatprep.mubr.bf16.mxu0 %v891_v3 }
  0x57   : > { %802 = vmatmul.mubr.msk.bf16.gmra.mxu0 %vm367_vm0, %v854_v52  ;;  %v615_v52 = vrot.slane %v810_v36, %v967_v17 }
 0x107   : > { %v417_v53 = vpop.f32.mrf.mxu0  ;;  %v447_v54 = vpop.f32.mrf.mxu1 }
 0x108   : > { %464 = vrot.lane.b32.xlu0 %v417_v53, %s892_s28 }
 0x109   : > { %v419_v55 = vpop.f32.mrf.mxu0  ;;  %v449_v56 = vpop.f32.mrf.mxu1 }
 0x10a   : > { %604 = vrot.lane.b32.xlu1 %v449_v56, %s893_s29  ;;  %v811_v56 = vld [vmem:[%s1055_s1 + $0x7] ss:$8 sm:$0x3] }
 0x10b   : > { %v421_v57 = vpop.f32.mrf.mxu0  ;;  %v451_v58 = vpop.f32.mrf.mxu1 }
 0x10c   : > { %602 = vrot.lane.b32.xlu0 %v447_v54, %s893_s29  ;;  %s818_s29 = sshll.u32 %s1059_s13, 4 }
 0x10d   : > { %v423_v59 = vpop.f32.mrf.mxu0  ;;  %v453_v60 = vpop.f32.mrf.mxu1 }
 0x10e   : > { %489 = vrot.lane.b32.xlu1 %v421_v57, %s894_s30 }
 0x10f   : > { %v427_v61 = vpop.f32.mrf.mxu0  ;;  %v457_v62 = vpop.f32.mrf.mxu1 }
 0x110   : > { %466 = vrot.lane.b32.xlu0 %v419_v55, %s892_s28 }
 0x111   : > { %v429_v63 = vpop.f32.mrf.mxu0  ;;  %v459_v0 = vpop.f32.mrf.mxu1 }
 0x112   : > { %491 = vrot.lane.b32.xlu1 %v423_v59, %s894_s30  ;;  %v591_v59 = vrot.slane %v809_v49, %v967_v17 }
 0x113   : > { %v431_v1 = vpop.f32.mrf.mxu0  ;;  %v461_v2 = vpop.f32.mrf.mxu1 }
 0x114   : > { %513 = vrot.lane.b32.xlu0 %v427_v61, %s895_s4  ;;  %v619_v2 = vrot.slane %v810_v36, %v969_v18 }
 0x115   : > { %v433_v3 = vpop.f32.mrf.mxu0  ;;  %v462_v4 = vpop.f32.mrf.mxu1 }
 0x116   : > { %515 = vrot.lane.b32.xlu1 %v429_v63, %s895_s4  ;;  %v643_v4 = vrot.slane %v811_v56, %v969_v18 }
 0x117   : > { %v954_v5 = vpop.f32.mrf.mxu0 }
 0x118   : > { %537 = vrot.lane.b32.xlu0 %v431_v1, %s896_s5 }
 0x119   : > { %v956_v6 = vpop.f32.mrf.mxu0 }
 0x11a   : > { %539 = vrot.lane.b32.xlu1 %v433_v3, %s896_s5  ;;  %v639_v3 = vrot.slane %v811_v56, %v967_v17  ;;  %s170_s5 = scalar_lea.vmem %s1057_s3, %s818_s29 }
 0x11b   : > { %v441_v7 = vpop.f32.mrf.mxu0 }
 0x11c   : > { %578 = vrot.lane.b32.xlu0 %v441_v7, %s897_s6  ;;  %v574_v7 = vmul.f32 %v567_v50, %v954_v5 }
 0x11d   : > { %v443_v8 = vpop.f32.mrf.mxu0 }
 0x11e   : > { %580 = vrot.lane.b32.xlu1 %v443_v8, %s897_s6  ;;  %v575_v8 = vmul.f32 %v571_v51, %v956_v6 }
 0x120   : > { %626 = vrot.lane.b32.xlu0 %v451_v58, %s898_s7 }
 0x122   : > { %628 = vrot.lane.b32.xlu1 %v453_v60, %s898_s7  ;;  %v595_v60 = vrot.slane %v809_v49, %v969_v18 }
 0x124   : > { %650 = vrot.lane.b32.xlu0 %v457_v62, %s899_s8 }
 0x126   : > { %652 = vrot.lane.b32.xlu1 %v459_v0, %s899_s8 }
 0x17a   : > { %v465_v10 = vpop.permute.xlu0 %464 }
 0x17c   : > { %v958_v11 = vpop.permute.xlu1 %604 }
 0x17e   : > { %v960_v13 = vpop.permute.xlu0 %602 }
 0x17f   : > { %v608_v16 = vsel %vm606_vm5, %v958_v11, %v960_v13 }
 0x180   : > { %v490_v15 = vpop.permute.xlu1 %489 }
 0x182   : > { %v467_v20 = vpop.permute.xlu0 %466 }
 0x183   : > { %v471_v34 = vsel %vm470_vm2, %v465_v10, %v467_v20  ;;  %v472_v35 = vsel %vm470_vm2, %v467_v20, %v465_v10 }
 0x184   : > { %v492_v24 = vpop.permute.xlu1 %491  ;;  %v485_v44 = vmul.f32 %v478_v25, %v472_v35  ;;  %v486_v45 = vmul.f32 %v482_v28, %v471_v34 }
 0x185   : > { %v494_v26 = vsel %vm493_vm1, %v490_v15, %v492_v24  ;;  %v495_v27 = vsel %vm493_vm1, %v492_v24, %v490_v15  ;;  %v607_v15 = vsel %vm606_vm5, %v960_v13, %v958_v11  ;;  %v812_v24 = vld [vmem:[%s1055_s1 + $0x10] ss:$8 sm:$0x3] }
 0x186   : > { %v514_v29 = vpop.permute.xlu0 %513  ;;  %v509_v37 = vmul.f32 %v502_v22, %v495_v27  ;;  %v510_v38 = vmul.f32 %v506_v23, %v494_v26  ;;  %v622_v25 = vmul.f32 %v615_v52, %v607_v15  ;;  %v623_v26 = vmul.f32 %v619_v2, %v608_v16 }
 0x188   : > { %v516_v39 = vpop.permute.xlu1 %515  ;;  %v511_v53 = vadd.f32 %v509_v37, %v485_v44  ;;  %v512_v54 = vadd.f32 %v510_v38, %v486_v45 }
 0x189   : > { %v518_v40 = vsel %vm517_vm3, %v514_v29, %v516_v39  ;;  %v519_v41 = vsel %vm517_vm3, %v516_v39, %v514_v29 }
 0x18a   : > { %v533_v46 = vmul.f32 %v526_v30, %v519_v41  ;;  %v534_v47 = vmul.f32 %v530_v31, %v518_v40  ;;  %v538_v48 = vpop.permute.xlu0 %537  ;;  %v663_v30 = vrot.slane %v812_v24, %v967_v17  ;;  %v667_v31 = vrot.slane %v812_v24, %v969_v18 }
 0x18c   : > { %v540_v55 = vpop.permute.xlu1 %539  ;;  %v535_v61 = vadd.f32 %v533_v46, %v511_v53  ;;  %v536_v62 = vadd.f32 %v534_v47, %v512_v54 }
 0x18d   : > { %v542_v57 = vsel %vm541_vm4, %v538_v48, %v540_v55  ;;  %v543_v58 = vsel %vm541_vm4, %v540_v55, %v538_v48 }
 0x18e   : > { %v557_v63 = vmul.f32 %v550_v42, %v543_v58  ;;  %v558_v0 = vmul.f32 %v554_v43, %v542_v57  ;;  %v579_v1 = vpop.permute.xlu0 %578 }
 0x190   : > { %v559_v9 = vadd.f32 %v557_v63, %v535_v61  ;;  %v560_v10 = vadd.f32 %v558_v0, %v536_v62  ;;  %v581_v12 = vpop.permute.xlu1 %580 }
 0x191   : > { %v583_v19 = vsel %vm582_vm6, %v579_v1, %v581_v12  ;;  %v584_v5 = vsel %vm582_vm6, %v581_v12, %v579_v1 }
 0x192   : > { %v576_v6 = vadd.f32 %v574_v7, %v559_v9  ;;  %v577_v20 = vadd.f32 %v575_v8, %v560_v10  ;;  %v598_v21 = vmul.f32 %v591_v59, %v583_v19  ;;  %v599_v22 = vmul.f32 %v595_v60, %v584_v5  ;;  %v627_v23 = vpop.permute.xlu0 %626 }
 0x194   : > { %v600_v11 = vadd.f32 %v598_v21, %v576_v6  ;;  %v601_v13 = vadd.f32 %v599_v22, %v577_v20  ;;  %v629_v27 = vpop.permute.xlu1 %628 }
 0x195   : > { %v631_v28 = vsel %vm630_vm7, %v627_v23, %v629_v27  ;;  %v632_v29 = vsel %vm630_vm7, %v629_v27, %v627_v23 }
 0x196   : > { %v624_v32 = vadd.f32 %v622_v25, %v600_v11  ;;  %v625_v33 = vadd.f32 %v623_v26, %v601_v13  ;;  %v646_v34 = vmul.f32 %v639_v3, %v631_v28  ;;  %v647_v35 = vmul.f32 %v643_v4, %v632_v29  ;;  %v651_v36 = vpop.permute.xlu0 %650 }
 0x198   : > { %v653_v37 = vpop.permute.xlu1 %652  ;;  %v648_v40 = vadd.f32 %v646_v34, %v624_v32  ;;  %v649_v41 = vadd.f32 %v647_v35, %v625_v33 }
 0x199   : > { %v655_v38 = vsel %vm654_vm8, %v651_v36, %v653_v37  ;;  %v656_v39 = vsel %vm654_vm8, %v653_v37, %v651_v36 }
 0x19a   : > { %v670_v42 = vmul.f32 %v663_v30, %v655_v38  ;;  %v671_v43 = vmul.f32 %v667_v31, %v656_v39 }
 0x19c   : > { %v672_v44 = vadd.f32 %v670_v42, %v648_v40  ;;  %v673_v17 = vadd.f32 %v671_v43, %v649_v41 }
 0x19e   : > { %v674_v45 = vadd.f32 %v673_v17, %v672_v44  ;;  %v677_v18 = vmul.f32 %v672_v44, %v672_v44  ;;  %v678_v46 = vmul.f32 %v673_v17, %v673_v17 }
 0x1a0   : > { %675 = vadd.xlane.f32.xlu0 %v674_v45  ;;  %v679_v47 = vadd.f32 %v678_v46, %v677_v18 }
 0x1a2   : > { %680 = vadd.xlane.f32.xlu1 %v679_v47 }
 0x229   : > { %v676_v48 = vpop.xlane.xlu0 %675 }
 0x22a   : > { %v682_v49 = vmul.f32 0.00390625, %v676_v48 }
 0x22b   : > { %v681_v50 = vpop.xlane.xlu1 %680 }
 0x22c   : > { %v683_v51 = vmul.f32 0.00390625, %v681_v50  ;;  %v684_v52 = vmul.f32 %v682_v49, %v682_v49  ;;  %v687_v55 = vsub.f32 %v672_v44, %v682_v49  ;;  %v688_v56 = vsub.f32 %v673_v17, %v682_v49 }
 0x22e   : > { %v685_v53 = vsub.f32 %v683_v51, %v684_v52 }
 0x230   : > { %v686_v14 = vmax.f32 %v685_v53, 0.0 }
 0x232   : > { %v689_v54 = vadd.f32 1e-05, %v686_v14 }
 0x234   : > { %872 = vrsqrt.f32 %v689_v54 }
 0x241   : > { %v873_v57 = vpop.eup %872 }
 0x242   : > { %v691_v58 = vmul.f32 %v873_v57, %v687_v55  ;;  %v692_v59 = vmul.f32 %v873_v57, %v688_v56 }
 0x244   : > { %v813_v60 = vmul.f32 -1.442695, %v691_v58  ;;  %v814_v61 = vmul.f32 -1.442695, %v692_v59 }
 0x246   : > { %874 = vpow2.f32 %v813_v60 }
 0x247   : > { %876 = vpow2.f32 %v814_v61 }
 0x253   : > { %v875_v62 = vpop.eup %874 }
 0x254   : > { %v877_v63 = vpop.eup %876  ;;  %v699_v0 = vadd.f32 1.0, %v875_v62 }
 0x255   : > { %v700_v1 = vadd.f32 1.0, %v877_v63 }
 0x256   : > { %878 = vrcp.f32 %v699_v0 }
 0x257   : > { %880 = vrcp.f32 %v700_v1 }
 0x263   : > { %v879_v2 = vpop.eup %878 }
 0x264   : > { %v881_v3 = vpop.eup %880  ;;  %v705_v4 = vmul.f32 %v879_v2, %v691_v58 }
 0x265   : > { %v706_v7 = vmul.f32 %v881_v3, %v692_v59 }
 0x266   : > { %707 = vst [vmem:[%s170_s5] sm:$0xff] %v705_v4 }
 0x267   : > { %708 = vst [vmem:[%s170_s5 + $0x8] sm:$0xff] %v706_v7 }
 0x268 PF: > { %s13_s12 = sadd.s32 1, %s888_s12  }
 0x269   : > { %p10_p4 = scmp.ge.s32.totalorder %s13_s12, 4  }
 0x26b   :  { %12 = sbr.rel (!%p10_p4) target bundleno = 1 (0x1), region = 70 }

</bundles_post_ra>
